<compile_context>
chip_gen: v5e
topology: v5e:2x2
jax: 0.10.0
libtpu: 0.0.40
codegen_flags: <defaults>
</compile_context>

<pallas_src>
import jax
import jax.numpy as jnp
from jax.experimental import pallas as pl
from jax.experimental.pallas import tpu as pltpu


# ---------------------------------------------------------------------------
# Kernels: one grid step handles the (batch b, time-tile t) block.
#   w_ref : (Cout, Cin)   VMEM, resident across the whole grid
#   b_ref : (Cout, 1)     VMEM, resident across the whole grid (f32)
#   x_ref : (1, Cin, Tt)  input tile
#   o_ref : (1, Cout, Tt) output tile
# ---------------------------------------------------------------------------
def _pw_kernel_bias(w_ref, b_ref, x_ref, o_ref):
    y = jnp.dot(w_ref[...], x_ref[0], preferred_element_type=jnp.float32)  # MXU
    o_ref[0] = (y + b_ref[...]).astype(o_ref.dtype)


def _pw_kernel_nobias(w_ref, x_ref, o_ref):
    y = jnp.dot(w_ref[...], x_ref[0], preferred_element_type=jnp.float32)  # MXU
    o_ref[0] = y.astype(o_ref.dtype)


# ---------------------------------------------------------------------------
# Tile-size / VMEM-budget selection.
# ---------------------------------------------------------------------------
def _vmem_limit_bytes():
    """~3/4 of physical VMEM (96 MiB on v5e/v6e, 48 MiB on v7x)."""
    vmem_phys = 64 << 20  # conservative fallback (v7x-sized)
    try:
        info = pltpu.get_tpu_info()
        vmem_phys = int(getattr(info, "vmem_capacity_bytes", vmem_phys))
    except Exception:
        pass
    return (vmem_phys * 3) // 4


def _pick_time_tile(B, Cin, Cout, Tc, itemsize, block_t, vmem_limit):
    """Choose the time-tile width bt (multiple of 128, or the full extent)."""
    # Double-buffered input + output tile bytes per time column.
    per_col = 2 * (Cin + Cout) * itemsize
    tile_budget = max(vmem_limit // 2, 1)          # headroom: weights, scratch, etc.
    bt_cap = max(128, tile_budget // per_col)
    bt = max(128, min(int(block_t), bt_cap))
    bt = (bt // 128) * 128                          # lane-dense multiple of 128

    if Tc <= bt:
        bt, nt = Tc, 1                              # full extent: always legal
    else:
        nt = pl.cdiv(Tc, bt)                        # ragged last tile handled by Pallas

    # v7x has 2 TensorCores: make sure a B==1 short-sequence case still yields
    # at least two parallel blocks.
    if B == 1 and nt == 1 and Tc >= 256:
        half = -(-Tc // 2)
        bt = ((half + 127) // 128) * 128
        nt = pl.cdiv(Tc, bt)
    return bt, nt


# ---------------------------------------------------------------------------
# Public wrapper: x (B, Cin, T) -> (B, Cout, T_out)
# ---------------------------------------------------------------------------
def pointwise_conv1d(x, weight, bias=None, *, stride=1, padding=0, block_t=8192):
    B, Cin, T = x.shape
    Cout = weight.shape[0]
    # PyTorch Conv1d weight layout (Cout, Cin, 1) -> (Cout, Cin); keep x's dtype
    # so bf16 inputs stay on the native bf16 MXU path (f32 accumulate in-kernel).
    w2d = weight.reshape(Cout, Cin).astype(x.dtype)

    pad_cols = 0
    if stride != 1:
        # TODO(synk): fuse strided time sampling into the kernel (strided DMA /
        # pl.ds stride) instead of this wrapper slice (extra HBM pass over x).
        if padding:
            x = jnp.pad(x, ((0, 0), (0, 0), (padding, padding)))
        x = x[:, :, ::stride]
    elif padding:
        # kernel_size == 1: output at padded positions is exactly `bias`, so we
        # only concat 2*padding bias columns after the kernel (no pass over x).
        pad_cols = padding
    Tc = x.shape[2]

    vmem_limit = _vmem_limit_bytes()
    bt, nt = _pick_time_tile(B, Cin, Cout, Tc, x.dtype.itemsize, block_t, vmem_limit)

    cparams = pltpu.CompilerParams(
        dimension_semantics=("parallel", "parallel"),
        vmem_limit_bytes=vmem_limit,
    )
    out_shape = jax.ShapeDtypeStruct((B, Cout, Tc), x.dtype)
    x_spec = pl.BlockSpec((1, Cin, bt), lambda b, t: (b, 0, t))
    o_spec = pl.BlockSpec((1, Cout, bt), lambda b, t: (b, 0, t))
    w_spec = pl.BlockSpec((Cout, Cin), lambda b, t: (0, 0))      # VMEM-resident

    if bias is not None:
        b2d = bias.reshape(Cout, 1).astype(jnp.float32)          # tiny, resident, f32 add
        b_spec = pl.BlockSpec((Cout, 1), lambda b, t: (0, 0))
        out = pl.pallas_call(
            _pw_kernel_bias,
            out_shape=out_shape,
            grid=(B, nt),
            in_specs=[w_spec, b_spec, x_spec],
            out_specs=o_spec,
            compiler_params=cparams,
        )(w2d, b2d, x)
    else:
        out = pl.pallas_call(
            _pw_kernel_nobias,
            out_shape=out_shape,
            grid=(B, nt),
            in_specs=[w_spec, x_spec],
            out_specs=o_spec,
            compiler_params=cparams,
        )(w2d, x)

    if pad_cols:
        if bias is not None:
            edge = jnp.broadcast_to(bias.astype(out.dtype)[None, :, None],
                                    (B, Cout, pad_cols))
        else:
            edge = jnp.zeros((B, Cout, pad_cols), out.dtype)
        out = jnp.concatenate([edge, out, edge], axis=-1)
    return out


# ---------------------------------------------------------------------------
# Demo / self-check
# ---------------------------------------------------------------------------
if __name__ == "__main__":
    key = jax.random.PRNGKey(0)
    k1, k2, k3 = jax.random.split(key, 3)

    # (batch, in_channels, time) — small shapes; time is a multiple of 128 so
    # the writeback is fully lane-dense.
    B, Cin, Cout, T = 2, 32, 64, 256
    x = jax.random.normal(k1, (B, Cin, T), jnp.float32)
    weight = 0.1 * jax.random.normal(k2, (Cout, Cin, 1), jnp.float32)  # PyTorch layout
    bias = 0.1 * jax.random.normal(k3, (Cout,), jnp.float32)

    # --- with bias (default stride=1, padding=0) ---
    out = jax.block_until_ready(pointwise_conv1d(x, weight, bias))
    assert out.shape == (B, Cout, T), out.shape
    ref = jnp.einsum("oi,bit->bot", weight[:, :, 0], x) + bias[None, :, None]
    assert jnp.allclose(out, ref, atol=1e-4, rtol=1e-4), float(jnp.max(jnp.abs(out - ref)))

    # --- without bias (exercises the no-bias kernel variant) ---
    out_nb = jax.block_until_ready(pointwise_conv1d(x, weight, None))
    ref_nb = jnp.einsum("oi,bit->bot", weight[:, :, 0], x)
    assert jnp.allclose(out_nb, ref_nb, atol=1e-4, rtol=1e-4)

    # --- padding path (stride=1): padded positions equal the bias ---
    pad = 2
    out_p = jax.block_until_ready(pointwise_conv1d(x, weight, bias, padding=pad))
    xp = jnp.pad(x, ((0, 0), (0, 0), (pad, pad)))
    ref_p = jnp.einsum("oi,bit->bot", weight[:, :, 0], xp) + bias[None, :, None]
    assert out_p.shape == (B, Cout, T + 2 * pad)
    assert jnp.allclose(out_p, ref_p, atol=1e-4, rtol=1e-4)

    print("KERNEL_OK")
</pallas_src>

<mosaic_0001>
module attributes {stable_mosaic.version = 11 : i64} {
  func.func @_pw_kernel_bias(%arg0: i32, %arg1: i32, %arg2: memref<64x32xf32, #tpu.memory_space<vmem>>, %arg3: memref<64x1xf32, #tpu.memory_space<vmem>>, %arg4: memref<1x32x256xf32, #tpu.memory_space<vmem>>, %arg5: memref<1x64x256xf32, #tpu.memory_space<vmem>>) attributes {dimension_semantics = [#tpu.dimension_semantics<parallel>, #tpu.dimension_semantics<parallel>], iteration_bounds = array<i64: 2, 1>, scalar_prefetch = 0 : i64, scratch_operands = 0 : i64, tpu.core_type = #tpu.core_type<tc>, window_params = [{pipeline_mode = #tpu.pipeline_mode<synchronous>, transform_indices = @transform_0, window_bounds = array<i64: 64, 32>}, {pipeline_mode = #tpu.pipeline_mode<synchronous>, transform_indices = @transform_1, window_bounds = array<i64: 64, 1>}, {transform_indices = @transform_2, window_bounds = array<i64: 1, 32, 256>}, {transform_indices = @transform_3, window_bounds = array<i64: 1, 64, 256>}]} {
    %c0 = arith.constant 0 : index
    %c0_0 = arith.constant 0 : index
    %0 = vector.load %arg2[%c0, %c0_0] : memref<64x32xf32, #tpu.memory_space<vmem>>, vector<64x32xf32>
    %c0_1 = arith.constant 0 : index
    %c0_2 = arith.constant 0 : index
    %c0_3 = arith.constant 0 : index
    %1 = vector.load %arg4[%c0_1, %c0_2, %c0_3] : memref<1x32x256xf32, #tpu.memory_space<vmem>>, vector<1x32x256xf32>
    %2 = vector.shape_cast %1 : vector<1x32x256xf32> to vector<32x256xf32>
    %cst = arith.constant dense<0.000000e+00> : vector<64x256xf32>
    %3 = tpu.matmul %0, %2, %cst {dimension_numbers = #tpu.dot_dimension_numbers<[1], [0], [0], [1], [0, 0, 1, 1], [], []>} : vector<64x32xf32>, vector<32x256xf32>, vector<64x256xf32> -> vector<64x256xf32>
    %c0_4 = arith.constant 0 : index
    %c0_5 = arith.constant 0 : index
    %4 = vector.load %arg3[%c0_4, %c0_5] : memref<64x1xf32, #tpu.memory_space<vmem>>, vector<64x1xf32>
    %5 = vector.broadcast %4 : vector<64x1xf32> to vector<64x256xf32>
    %6 = arith.addf %3, %5 : vector<64x256xf32>
    %c0_6 = arith.constant 0 : index
    %c0_7 = arith.constant 0 : index
    %c0_8 = arith.constant 0 : index
    %7 = vector.load %arg5[%c0_6, %c0_7, %c0_8] : memref<1x64x256xf32, #tpu.memory_space<vmem>>, vector<1x64x256xf32>
    %8 = vector.shape_cast %7 : vector<1x64x256xf32> to vector<64x256xf32>
    %9 = vector.shape_cast %6 : vector<64x256xf32> to vector<1x64x256xf32>
    tpu.vector_store %arg5[%c0_6, %c0_7, %c0_8], %9 {strides = array<i32>} : memref<1x64x256xf32, #tpu.memory_space<vmem>>, vector<1x64x256xf32>,
    return
  }
  func.func @transform_0(%arg0: i32, %arg1: i32) -> (i32, i32) {
    %c0_i32 = arith.constant 0 : i32
    %c0_i32_0 = arith.constant 0 : i32
    %c0_i32_1 = arith.constant 0 : i32
    return %c0_i32, %c0_i32_0 : i32, i32
  }
  func.func @transform_1(%arg0: i32, %arg1: i32) -> (i32, i32) {
    %c0_i32 = arith.constant 0 : i32
    %c0_i32_0 = arith.constant 0 : i32
    %c0_i32_1 = arith.constant 0 : i32
    return %c0_i32, %c0_i32_0 : i32, i32
  }
  func.func @transform_2(%arg0: i32, %arg1: i32) -> (i32, i32, i32) {
    %c0_i32 = arith.constant 0 : i32
    %c0_i32_0 = arith.constant 0 : i32
    return %arg0, %c0_i32, %arg1 : i32, i32, i32
  }
  func.func @transform_3(%arg0: i32, %arg1: i32) -> (i32, i32, i32) {
    %c0_i32 = arith.constant 0 : i32
    %c0_i32_0 = arith.constant 0 : i32
    return %arg0, %c0_i32, %arg1 : i32, i32, i32
  }
}

</mosaic_0001>

<bundles_post_ra>
// kernel: tpu_custom_call.1
= control target key start
LH: loop header
LB: loop body
LE: loop exit
PB: predicated region body
PF: predicated region fallthrough
CT: control target
= control target key end

     0   :  { %8 = vsyncpa [#allocation3], 0  ;;  %s871_s0 = inlined_call_operand.vmem [shape: f32[64,32], index: 0, kind: input, shape index: {}]   ;;  %s872_s1 = inlined_call_operand.vmem [shape: f32[64,1], index: 1, kind: input, shape index: {}]   ;;  %s873_s2 = inlined_call_operand.vmem [shape: f32[2,32,256], index: 2, kind: input, shape index: {}]   ;;  %s874_s3 = inlined_call_operand.hbm [shape: f32[2,64,256], index: 3, kind: output, shape index: {}]  }
   0x1   :  { %10 = vsyncpa [#allocation3 + $0x1], 0  ;;  %s687_s12 = smov 0   ;;  %s689_s13 = smov 0  }
   0x2   :  { %s691_s14 = smov 0   ;;  %s693_s15 = smov 0  }
   0x3   :  { %s695_s16 = smov 0   ;;  %s697_s17 = smov 0  }
   0x4 LB: > { %s484_s18 = sadd.s32 4294967295, %s662_s17   ;;  %s485_s19 = sadd.s32 4294967294, %s662_s17   ;;  %s662_s17 = sphi %s697_s17, %s16_s17   ;;  %s658_s16 = sphi %s695_s16, %s881_s16   ;;  %s654_s15 = sphi %s693_s15, %s880_s15   ;;  %s650_s14 = sphi %s691_s14, %s879_s14   ;;  %s646_s13 = sphi %s689_s13, %s878_s13   ;;  %s642_s12 = sphi %s687_s12, %s877_s12  }
   0x5   : > { %s28_s20 = sadd.s32 1, %s658_s16  ;;  %s107_s21 = sadd.s32 1, %s650_s14 }
   0x6   : > { %p30_p0 = scmp.ge.s32.totalorder %s28_s20, 2  ;;  %p117_p1 = scmp.ne.s32.totalorder %s650_s14, %s646_s13 }
   0x7   : > { %p118_p2 = scmp.eq.s32.totalorder %s484_s18, 1  ;;  %p123_p3 = scmp.ne.s32.totalorder %s646_s13, %s642_s12 }
   0x8   : > { %s883_s20 = smov (%p30_p0, %s28_s20), 0  ;;  %p124_p5 = scmp.eq.s32.totalorder %s485_s19, 1 }
   0x9   : > { %p727_p4 = por %p118_p2, %p117_p1  ;;  %s102_s23 = ssub.s32 %s658_s16, %s883_s20 }
   0xa   : > { %p488_p6 = scmp.ge.s32.totalorder %s662_s17, 1  ;;  %p105_p7 = scmp.eq.s32.totalorder %s102_s23, 0 }
   0xb   : > { %p734_p8 = por %p124_p5, %p123_p3  ;;  %p161_p9 = scmp.lt.s32.totalorder %s662_s17, 3 }
   0xc   : > { %s740_s25 = scalar_select %p105_p7, %s650_s14, %s107_s21  }
   0xd   : > { %p162_p10 = pnand %p488_p6, %p161_p9 }
   0xe   : > { %p190_p11 = scmp.lt.s32.totalorder (!%p162_p10), %s654_s15, 1  ;;  %s186_s29 = sand.u32 (!%p162_p10), 1, %s646_s13  }
   0xf   : > { %165 = sbr.rel (%p162_p10) target bundleno = 196 (0xc4), region = 32  ;;  %s514_s5 = sshll.u32 (!%p162_p10), %s654_s15, 7 }
  0x10   : > { %s401_s8 = scalar_lea.hbm (!%p162_p10), %s874_s3, %s514_s5  ;;  %s388_s10 = scalar_lea.sflag (!%p162_p10), [#allocation3], %s186_s29 }
  0x11   : > { %s604_s23 = scalar_lea.hbm (!%p162_p10), %s874_s3, 256 }
  0x14   : > { %v664_v0 = vmov 0   ;;  %v218_v1 = vld [vmem:[%s872_s1 + $0x10] sm:$0xff]  ;;  %v216_v2 = vld [vmem:[%s872_s1] sm:$0xff]  ;;  %s191_s30 = scalar_select %p190_p11, %s654_s15, 1  ;;  %vm264_vm0 = vcmask 261120   ;;  %v219_v13 = vld [vmem:[%s872_s1 + $0x18] sm:$0xff] }
  0x15   : > { %582 = vset.pattern.permute.xlu1 %v664_v0  ;;  %581 = vset.pattern.permute.xlu0 %v664_v0  ;;  %v200_v11 = vld [vmem:[%s871_s0] sm:$0xff]  ;;  %v217_v14 = vld [vmem:[%s872_s1 + $0x8] sm:$0xff]  ;;  %v223_v18 = vld [vmem:[%s872_s1 + $0x38] sm:$0xff]  ;;  %s404_s15 = sshll.u32 %s401_s8, 4  ;;  %s405_s15 = int_to_ptr.hbm [resolvable:$true] %s404_s15 }
  0x16   : > { %236 = vperm.xlu1 %582, %v218_v1   ;;  %226 = vperm.xlu0 %581, %v216_v2   ;;  %s513_s4 = sshll.u32 %s191_s30, 6  ;;  %v204_v12 = vld [vmem:[%s871_s0 + $0x20] sm:$0xff]  ;;  %v201_v16 = vld [vmem:[%s871_s0 + $0x8] sm:$0xff]  ;;  %v222_v19 = vld [vmem:[%s872_s1 + $0x30] sm:$0xff]  ;;  %s489_s30 = sshll.u32 %s186_s29, 7 }
  0x17   : > { %583 = vset.pattern.permute.xlu2 %v664_v0  ;;  %s197_s7 = scalar_lea.vmem %s873_s2, %s513_s4  ;;  %v220_v15 = vld [vmem:[%s872_s1 + $0x20] sm:$0xff]  ;;  %v205_v17 = vld [vmem:[%s871_s0 + $0x28] sm:$0xff]  ;;  %v202_v21 = vld [vmem:[%s871_s0 + $0x10] sm:$0xff]  ;;  %s814_s4 = scalar_lea.vmem [#allocation2], %s489_s30 }
  0x18   : > { %v214_v3 = vld [vmem:[%s197_s7 + $0x30] sm:$0xff]  ;;  %v215_v4 = vld [vmem:[%s197_s7 + $0x38] sm:$0xff]  ;;  %v212_v5 = vld [vmem:[%s197_s7 + $0x20] sm:$0xff]  ;;  %246 = vperm.xlu2 %583, %v220_v15   ;;  %s402_s9 = sshll.u32 %s814_s4, 4  ;;  %s598_s11 = sshra.s32 %s405_s15, 4  ;;  %s403_s9 = int_to_ptr.vmem [resolvable:$true] %s402_s9  ;;  %s599_s11 = int_to_ptr.hbm [resolvable:$true] %s598_s11 }
  0x19   : > { %301 = vmatpush.msra.mxu0 %v214_v3  ;;  %515 = vmatpush.msra.mxu2 %v214_v3  ;;  %v213_v6 = vld [vmem:[%s197_s7 + $0x28] sm:$0xff]  ;;  %v210_v7 = vld [vmem:[%s197_s7 + $0x10] sm:$0xff]  ;;  %v211_v8 = vld [vmem:[%s197_s7 + $0x18] sm:$0xff]  ;;  %s600_s18 = scalar_lea.hbm %s599_s11, 128  ;;  %p605_p1 = scmp.lt.s32.totalorder %s599_s11, %s874_s3 }
  0x1a   : > { %342 = vmatpush.msra.mxu1 %v215_v4  ;;  %519 = vmatpush.msra.mxu3 %v215_v4  ;;  %v208_v9 = vld [vmem:[%s197_s7] sm:$0xff]  ;;  %v209_v10 = vld [vmem:[%s197_s7 + $0x8] sm:$0xff]  ;;  %v206_v22 = vld [vmem:[%s871_s0 + $0x30] sm:$0xff]  ;;  %p601_p12 = scmp.ne.s32.totalorder %s599_s11, %s600_s18  ;;  %p606_p2 = scmp.lt.s32.totalorder %s604_s23, %s600_s18 }
  0x1b   : > { %302 = vmatpush.msra.mxu0 %v212_v5  ;;  %516 = vmatpush.msra.mxu2 %v212_v5  ;;  %v221_v20 = vld [vmem:[%s872_s1 + $0x28] sm:$0xff]  ;;  %v203_v23 = vld [vmem:[%s871_s0 + $0x18] sm:$0xff] }
  0x1c   : > { %343 = vmatpush.msra.mxu1 %v213_v6  ;;  %520 = vmatpush.msra.mxu3 %v213_v6  ;;  %v207_v24 = vld [vmem:[%s871_s0 + $0x38] sm:$0xff]  ;;  %p602_p13 = pnand %p601_p12, %p727_p4  ;;  %p607_p3 = por %p606_p2, %p605_p1 }
  0x1d   : > { %303 = vmatpush.msra.mxu0 %v210_v7  ;;  %517 = vmatpush.msra.mxu2 %v210_v7 }
  0x1e   : > { %344 = vmatpush.msra.mxu1 %v211_v8  ;;  %521 = vmatpush.msra.mxu3 %v211_v8  ;;  %p603_p0 = pneg %p602_p13 }
  0x1f   : > { %304 = vmatpush.msra.mxu0 %v208_v9  ;;  %518 = vmatpush.msra.mxu2 %v208_v9 }
  0x20   : > { %345 = vmatpush.msra.mxu1 %v209_v10  ;;  %522 = vmatpush.msra.mxu3 %v209_v10  ;;  %p608_p5 = pnand %p607_p3, %p603_p0 }
  0x21   : > { %492 = vmatmul.msk.f32.vlgmr.msra.gmra.mxu0 %vm264_vm0, %v200_v11  ;;  %496 = vmatmul.msk.f32.vlgmr.msra.gmra.mxu2 %vm264_vm0, %v204_v12 }
  0x22   : > { %500 = vmatmul.msk.f32.vlgmr.msra.gmra.mxu1 %vm264_vm0, %v200_v11  ;;  %504 = vmatmul.msk.f32.vlgmr.msra.gmra.mxu3 %vm264_vm0, %v204_v12 }
  0x23   : > { %241 = vperm.xlu1 %582, %v219_v13   ;;  %231 = vperm.xlu0 %581, %v217_v14  }
  0x24   : > { %251 = vperm.xlu2 %583, %v221_v20  }
  0x29   : > { %493 = vmatmul.msk.f32.gmra.mxu0 %vm264_vm0, %v201_v16  ;;  %497 = vmatmul.msk.f32.gmra.mxu2 %vm264_vm0, %v205_v17 }
  0x2a   : > { %501 = vmatmul.msk.f32.gmra.mxu1 %vm264_vm0, %v201_v16  ;;  %505 = vmatmul.msk.f32.gmra.mxu3 %vm264_vm0, %v205_v17 }
  0x2b   : > { %261 = vperm.xlu1 %582, %v223_v18   ;;  %256 = vperm.xlu0 %581, %v222_v19  }
  0x31   : > { %494 = vmatmul.msk.f32.gmra.mxu0 %vm264_vm0, %v202_v21  ;;  %498 = vmatmul.msk.f32.gmra.mxu2 %vm264_vm0, %v206_v22 }
  0x32   : > { %502 = vmatmul.msk.f32.gmra.mxu1 %vm264_vm0, %v202_v21  ;;  %506 = vmatmul.msk.f32.gmra.mxu3 %vm264_vm0, %v206_v22 }
  0x39   : > { %495 = vmatmul.msk.f32.gmra.mxu0 %vm264_vm0, %v203_v23  ;;  %499 = vmatmul.msk.f32.gmra.mxu2 %vm264_vm0, %v207_v24 }
  0x3a   : > { %503 = vmatmul.msk.f32.gmra.mxu1 %vm264_vm0, %v203_v23  ;;  %507 = vmatmul.msk.f32.gmra.mxu3 %vm264_vm0, %v207_v24 }
  0x72   : > { %v247_v30 = vpop.permute.xlu2 %246 }
  0x7e   : > { %v252_v41 = vpop.permute.xlu2 %251 }
  0x88   : > { %v227_v25 = vpop.permute.xlu0 %226  ;;  %v237_v39 = vpop.permute.xlu1 %236 }
  0x95   : > { %v232_v34 = vpop.permute.xlu0 %231  ;;  %v242_v50 = vpop.permute.xlu1 %241 }
  0x9d   : > { %v257_v51 = vpop.permute.xlu0 %256  ;;  %v262_v60 = vpop.permute.xlu1 %261 }
  0x9e   : > { %v306_v26 = vpop.f32.mrf.mxu0 }
  0x9f   : > { %v307_v27 = vadd.f32 %v306_v26, %v227_v25  ;;  %v347_v28 = vpop.f32.mrf.mxu1 }
  0xa0   : > { %v348_v29 = vadd.f32 %v347_v28, %v227_v25 }
  0xa1   : > { %371 = vst [vmem:[%s814_s4] sm:$0xff] %v307_v27 }
  0xa2   : > { %372 = vst [vmem:[%s814_s4 + $0x8] sm:$0xff] %v348_v29 }
  0xa4   : > { %v318_v31 = vpop.f32.mrf.mxu2 }
  0xa5   : > { %v319_v32 = vadd.f32 %v318_v31, %v247_v30  ;;  %v359_v33 = vpop.f32.mrf.mxu3 }
  0xa6   : > { %v360_v35 = vadd.f32 %v359_v33, %v247_v30  ;;  %v309_v36 = vpop.f32.mrf.mxu0 }
  0xa7   : > { %379 = vst [vmem:[%s814_s4 + $0x40] sm:$0xff] %v319_v32  ;;  %v310_v37 = vadd.f32 %v309_v36, %v232_v34  ;;  %v350_v38 = vpop.f32.mrf.mxu1 }
  0xa8   : > { %380 = vst [vmem:[%s814_s4 + $0x48] sm:$0xff] %v360_v35  ;;  %v351_v40 = vadd.f32 %v350_v38, %v232_v34 }
  0xa9   : > { %373 = vst [vmem:[%s814_s4 + $0x10] sm:$0xff] %v310_v37 }
  0xaa   : > { %374 = vst [vmem:[%s814_s4 + $0x18] sm:$0xff] %v351_v40 }
  0xac   : > { %v321_v42 = vpop.f32.mrf.mxu2 }
  0xad   : > { %v322_v43 = vadd.f32 %v321_v42, %v252_v41  ;;  %v362_v44 = vpop.f32.mrf.mxu3 }
  0xae   : > { %v363_v45 = vadd.f32 %v362_v44, %v252_v41  ;;  %v312_v46 = vpop.f32.mrf.mxu0 }
  0xaf   : > { %381 = vst [vmem:[%s814_s4 + $0x50] sm:$0xff] %v322_v43  ;;  %v313_v47 = vadd.f32 %v312_v46, %v237_v39  ;;  %v353_v48 = vpop.f32.mrf.mxu1 }
  0xb0   : > { %382 = vst [vmem:[%s814_s4 + $0x58] sm:$0xff] %v363_v45  ;;  %v354_v49 = vadd.f32 %v353_v48, %v237_v39 }
  0xb1   : > { %375 = vst [vmem:[%s814_s4 + $0x20] sm:$0xff] %v313_v47 }
  0xb2   : > { %376 = vst [vmem:[%s814_s4 + $0x28] sm:$0xff] %v354_v49 }
  0xb4   : > { %v324_v52 = vpop.f32.mrf.mxu2 }
  0xb5   : > { %v325_v53 = vadd.f32 %v324_v52, %v257_v51  ;;  %v365_v54 = vpop.f32.mrf.mxu3 }
  0xb6   : > { %v366_v55 = vadd.f32 %v365_v54, %v257_v51  ;;  %v315_v56 = vpop.f32.mrf.mxu0 }
  0xb7   : > { %383 = vst [vmem:[%s814_s4 + $0x60] sm:$0xff] %v325_v53  ;;  %v316_v57 = vadd.f32 %v315_v56, %v242_v50  ;;  %v356_v58 = vpop.f32.mrf.mxu1 }
  0xb8   : > { %384 = vst [vmem:[%s814_s4 + $0x68] sm:$0xff] %v366_v55  ;;  %v357_v59 = vadd.f32 %v356_v58, %v242_v50 }
  0xb9   : > { %377 = vst [vmem:[%s814_s4 + $0x30] sm:$0xff] %v316_v57 }
  0xba   : > { %378 = vst [vmem:[%s814_s4 + $0x38] sm:$0xff] %v357_v59 }
  0xbc   : > { %v327_v61 = vpop.f32.mrf.mxu2 }
  0xbd   : > { %v328_v62 = vadd.f32 %v327_v61, %v262_v60  ;;  %v368_v63 = vpop.f32.mrf.mxu3 }
  0xbe   : > { %v369_v0 = vadd.f32 %v368_v63, %v262_v60 }
  0xbf   : > { %385 = vst [vmem:[%s814_s4 + $0x70] sm:$0xff] %v328_v62 }
  0xc0   : > { %386 = vst [vmem:[%s814_s4 + $0x78] sm:$0xff] %v369_v0 }
  0xc1   : > { %611 = shalt.err (!%p608_p5)
}
  0xc2   : > { %s665_s28 = smov 256   ;;  %s666_s29 = smov 16  }
  0xc3   : > { %523 = dma.vmem_to_hbm [thread:$0]  (%p727_p4), %s403_s9, 2048, %s405_s15, %s388_s10, %s665_s28, %s665_s28, %s666_s29  }
  0xc4 PF: > { %p529_p6 = scmp.ge.s32.totalorder %s662_s17, 2  ;;  %s419_s30 = sand.u32 1, %s642_s12  }
  0xc5   : > { %s420_s4 = scalar_lea.sflag [#allocation3], %s419_s30 }
  0xc6   : > { %p526_p7 = pnand %p529_p6, %p734_p8 }
  0xc8   : > { %p527_p9 = pneg %p526_p7 }
  0xca   : > { %637 = dma.done.wait (%p527_p9), %s420_s4, 2048  }
  0xcb   : > { %639 = vsyncadd (%p527_p9), %s420_s4, 4294965248  ;;  %s16_s17 = sadd.s32 1, %s662_s17   ;;  %s877_s12 = smov %s646_s13 }
  0xcc   : > { %p13_p10 = scmp.ge.s32.totalorder %s16_s17, 4   ;;  %s878_s13 = smov %s650_s14 }
  0xcd   : > { %s879_s14 = smov %s740_s25  ;;  %s880_s15 = smov %s658_s16 }
  0xce   : > { %s881_s16 = smov %s883_s20  ;;  %15 = sbr.rel (!%p13_p10) target bundleno = 4 (0x4), region = 67 }
  0xd3   :  { %426 = vsyncpa [#allocation3], 1 }
  0xd4   :  { %428 = vsyncpa [#allocation3 + $0x1], 1 }

</bundles_post_ra>
